<compile_context>
chip_gen: v6e
topology: v6e:2x2x1
jax: 0.10.0
libtpu: 0.0.40
codegen_flags: <defaults>
</compile_context>

<pallas_src>
import functools

import numpy as np
import jax
import jax.numpy as jnp
from jax.experimental import pallas as pl
from jax.experimental.pallas import tpu as pltpu


# ---------------------------------------------------------------------------
# Shared helpers
# ---------------------------------------------------------------------------
def _layer_norm(x, gamma, beta, eps):
    # PyTorch LayerNorm: biased variance over the last dim.
    mean = jnp.mean(x, axis=-1, keepdims=True)
    var = jnp.mean((x - mean) ** 2, axis=-1, keepdims=True)
    return (x - mean) * jax.lax.rsqrt(var + eps) * gamma + beta


def _vmem_capacity_bytes():
    try:
        return int(pltpu.get_tpu_info().vmem_capacity_bytes)
    except Exception:
        return 64 * 1024 * 1024          # conservative fallback (v7x per-core)


# ---------------------------------------------------------------------------
# Fused encoder kernel: grid = (batch_tiles, num_layers)
#   * layer axis is sequential ("arbitrary"); the activation lives resident in
#     the output VMEM block across layers (no per-layer HBM round trip; layer
#     l+1 weights prefetch while layer l computes).
# ---------------------------------------------------------------------------
def encoder_kernel(x0_ref, wq_ref, wk_ref, wv_ref, wh_ref, w1_ref, w2_ref,
                   sm_ref, o_ref, hcat_ref, *, bt, S, D, H, nh, d_k):
    l = pl.program_id(1)
    M = bt * S

    # Load the initial activation once per batch tile (first layer step only).
    @pl.when(l == 0)
    def _():
        o_ref[...] = x0_ref[...]

    # Resident activation (same output block index for every layer l).
    x = o_ref[...].reshape(M, D)                       # f32
    xb = x.astype(jnp.bfloat16)

    # Packed per-layer bias / LN params: (8, max(D,H)) f32.
    sm = sm_ref[0]
    bh, b1, b2 = sm[0:1, :D], sm[1:2, :H], sm[2:3, :D]
    g1, bb1 = sm[3:4, :D], sm[4:5, :D]
    g2, bb2 = sm[5:6, :D], sm[6:7, :D]

    # ---- multi-head self-attention (no mask, matching the reference) ----
    # Full-width projections (N = D fills the MXU); scale applied in f32 like
    # the reference; q/k/v cast to bf16 once.
    scale = 1.0 / float(np.sqrt(d_k))
    q = (jnp.dot(xb, wq_ref[0], preferred_element_type=jnp.float32)
         * scale).astype(jnp.bfloat16)
    k = jnp.dot(xb, wk_ref[0], preferred_element_type=jnp.float32).astype(jnp.bfloat16)
    v = jnp.dot(xb, wv_ref[0], preferred_element_type=jnp.float32).astype(jnp.bfloat16)

    # Per-head scores / softmax / PV; head outputs assembled into a VMEM
    # scratch so the output projection is a single full-width matmul.
    # (nh is small; each head's (bt,S,S) block dies within the iteration.)
    for h in range(nh):
        sl = slice(h * d_k, (h + 1) * d_k)
        qh = q[:, sl].reshape(bt, S, d_k)
        kh = k[:, sl].reshape(bt, S, d_k)
        vh = v[:, sl].reshape(bt, S, d_k)

        s = jnp.einsum("bqd,bkd->bqk", qh, kh,
                       preferred_element_type=jnp.float32)       # (bt,S,S)
        s = s - jnp.max(s, axis=-1, keepdims=True)
        p = jnp.exp(s)
        # approx reciprocal on the EUP (~1e-3 rel. error on attention probs);
        # set approx=False for exact parity testing.
        p = p * pl.reciprocal(jnp.sum(p, axis=-1, keepdims=True), approx=True)

        hv = jnp.einsum("bqk,bkd->bqd", p.astype(jnp.bfloat16), vh,
                        preferred_element_type=jnp.float32)      # (bt,S,d_k)
        hcat_ref[:, sl] = hv.reshape(M, d_k)

    attn = jnp.dot(hcat_ref[...].astype(jnp.bfloat16), wh_ref[0],
                   preferred_element_type=jnp.float32) + bh

    # ---- residual + LayerNorm1 (eps=1e-6) ----
    out1 = _layer_norm(x + attn, g1, bb1, 1e-6)

    # ---- "CNN" MLP: Linear -> ReLU -> Linear ----
    hid = jnp.maximum(
        jnp.dot(out1.astype(jnp.bfloat16), w1_ref[0],
                preferred_element_type=jnp.float32) + b1, 0.0)
    ffn = jnp.dot(hid.astype(jnp.bfloat16), w2_ref[0],
                  preferred_element_type=jnp.float32) + b2

    # ---- residual + LayerNorm2 (eps=1e-6) ----
    out2 = _layer_norm(out1 + ffn, g2, bb2, 1e-6)

    # HBM writeback happens once per batch tile (when the block index changes).
    o_ref[...] = out2.reshape(bt, S, D)


# ---------------------------------------------------------------------------
# VMEM-budget driven tiling
# ---------------------------------------------------------------------------
def _select_tiling(B, S, D, H, nh):
    cap = _vmem_capacity_bytes()
    vmem_limit = int(0.85 * cap)

    # Per-layer bf16 weight blocks, double-buffered by the BlockSpec pipeline,
    # plus the tiny packed bias/LN block.
    weight_bytes = 2 * (2 * (4 * D * D + 2 * D * H)) + 2 * 4 * 8 * max(D, H)
    act_budget = max(vmem_limit - weight_bytes - (4 << 20), 1 << 20)

    def footprint(bt):
        m = bt * S
        act_blocks = 4 * m * D * 4                 # x0 + out blocks, 2 bufs each, f32
        scratch = 4 * m * D                        # hcat scratch (f32)
        # rough working set: q/k/v (bf16+f32), FFN hidden, one head's scores
        temps = m * (16 * D + 8 * H) + 8 * bt * S * S
        return act_blocks + scratch + temps

    divisors = [d for d in range(1, B + 1) if B % d == 0]
    fitting = [d for d in divisors if footprint(d) <= act_budget] or [1]
    bt = fitting[-1]

    # Keep >= 2 batch tiles so the "parallel" axis can span both v7x
    # TensorCores, unless shrinking would starve the MXU (< 512 rows) while a
    # single full tile had enough rows.
    if bt == B and B > 1:
        smaller = [d for d in fitting if d < B]
        if smaller and (smaller[-1] * S >= 512 or B * S < 512):
            bt = smaller[-1]
    return bt, vmem_limit


# ---------------------------------------------------------------------------
# pallas_call wrapper
# ---------------------------------------------------------------------------
def encoder_pallas(x0, packed, num_heads, batch_tile=None):
    B, S, D = x0.shape
    L = packed["wq"].shape[0]
    H = packed["w1"].shape[-1]
    nh = num_heads
    assert D % nh == 0
    d_k = D // nh
    Hmax = packed["small"].shape[-1]

    bt_auto, vmem_limit = _select_tiling(B, S, D, H, nh)
    bt = batch_tile if batch_tile is not None else bt_auto
    assert B % bt == 0
    n_bt = B // bt

    act_map = lambda b, l: (b, 0, 0)      # activation blocks keyed on batch tile only
    lw = lambda b, l: (l, 0, 0)           # per-layer weights keyed on layer only

    kernel = functools.partial(encoder_kernel,
                               bt=bt, S=S, D=D, H=H, nh=nh, d_k=d_k)

    return pl.pallas_call(
        kernel,
        out_shape=jax.ShapeDtypeStruct((B, S, D), jnp.float32),
        grid=(n_bt, L),
        in_specs=[
            pl.BlockSpec((bt, S, D), act_map),    # x0 (initial activation, f32)
            pl.BlockSpec((1, D, D), lw),          # Wq  bf16
            pl.BlockSpec((1, D, D), lw),          # Wk  bf16
            pl.BlockSpec((1, D, D), lw),          # Wv  bf16
            pl.BlockSpec((1, D, D), lw),          # Wo  bf16
            pl.BlockSpec((1, D, H), lw),          # W1  bf16
            pl.BlockSpec((1, H, D), lw),          # W2  bf16
            pl.BlockSpec((1, 8, Hmax), lw),       # packed biases / LN params (f32)
        ],
        out_specs=pl.BlockSpec((bt, S, D), act_map),
        scratch_shapes=[pltpu.VMEM((bt * S, D), jnp.float32)],   # head-concat buffer
        input_output_aliases={0: 0},              # donate x0's HBM buffer to the output
        compiler_params=pltpu.CompilerParams(
            dimension_semantics=("parallel", "arbitrary"),
            vmem_limit_bytes=vmem_limit),
    )(x0, packed["wq"], packed["wk"], packed["wv"], packed["wh"],
      packed["w1"], packed["w2"], packed["small"])


# ---------------------------------------------------------------------------
# Parameter init (PyTorch-like layout) and packing for the kernel
# ---------------------------------------------------------------------------
def init_params(key, num_layers, d_model, ff_hidden, vocab, max_pos):
    kw, *lkeys = jax.random.split(key, 1 + num_layers)

    # Word embeddings (padding_idx=1 row zeroed, as in nn.Embedding(padding_idx=1)).
    word_emb = jax.random.normal(kw, (vocab, d_model), jnp.float32) * 0.02
    word_emb = word_emb.at[1].set(0.0)

    # Sinusoidal position embeddings matching Embeddings.create_posemb.
    j = np.arange(d_model)
    pos = np.arange(max_pos)[:, None]
    theta = pos / np.power(10000.0, 2 * (j // 2) / d_model)
    pe = np.zeros((max_pos, d_model), np.float32)
    pe[:, 0::2] = np.sin(theta[:, 0::2])
    pe[:, 1::2] = np.cos(theta[:, 1::2])

    params = {
        "word_emb": word_emb,
        "pos_emb": jnp.asarray(pe),
        "emb_ln_g": jnp.ones((1, d_model), jnp.float32),
        "emb_ln_b": jnp.zeros((1, d_model), jnp.float32),
        "layers": [],
    }

    for lk in lkeys:
        ks = jax.random.split(lk, 8)
        s_d = 1.0 / np.sqrt(d_model)
        s_h = 1.0 / np.sqrt(ff_hidden)
        lp = {
            # (in, out) layout so y = x @ W + b
            "wq": jax.random.uniform(ks[0], (d_model, d_model), jnp.float32, -s_d, s_d),
            "wk": jax.random.uniform(ks[1], (d_model, d_model), jnp.float32, -s_d, s_d),
            "wv": jax.random.uniform(ks[2], (d_model, d_model), jnp.float32, -s_d, s_d),
            "wh": jax.random.uniform(ks[3], (d_model, d_model), jnp.float32, -s_d, s_d),
            "bh": jax.random.uniform(ks[4], (1, d_model), jnp.float32, -s_d, s_d),
            "w1": jax.random.uniform(ks[5], (d_model, ff_hidden), jnp.float32, -s_d, s_d),
            "b1": jax.random.uniform(ks[6], (1, ff_hidden), jnp.float32, -s_d, s_d),
            "w2": jax.random.uniform(ks[7], (ff_hidden, d_model), jnp.float32, -s_h, s_h),
            "b2": jnp.zeros((1, d_model), jnp.float32),
            "ln1_g": jnp.ones((1, d_model), jnp.float32),
            "ln1_b": jnp.zeros((1, d_model), jnp.float32),
            "ln2_g": jnp.ones((1, d_model), jnp.float32),
            "ln2_b": jnp.zeros((1, d_model), jnp.float32),
        }
        params["layers"].append(lp)
    return params


def pack_layer_params(layers):
    """Stack per-layer weights to (L, ...), cast matmul weights to bf16 (MXU
    inputs, half the DMA/VMEM bytes), and pack the 7 small bias/LN vectors
    into one (L, 8, max(D,H)) f32 array (1 DMA descriptor per grid step)."""
    L = len(layers)
    D = layers[0]["wq"].shape[0]
    H = layers[0]["w1"].shape[1]
    hmax = max(D, H)

    def stack(name):
        return jnp.stack([lp[name] for lp in layers])

    def pad_row(v):
        v = v.reshape(-1)
        return jnp.pad(v, (0, hmax - v.shape[0]))

    small = jnp.stack([
        jnp.stack([pad_row(lp["bh"]), pad_row(lp["b1"]), pad_row(lp["b2"]),
                   pad_row(lp["ln1_g"]), pad_row(lp["ln1_b"]),
                   pad_row(lp["ln2_g"]), pad_row(lp["ln2_b"]),
                   jnp.zeros((hmax,), jnp.float32)])
        for lp in layers])                                   # (L, 8, hmax)

    return {
        "wq": stack("wq").astype(jnp.bfloat16),
        "wk": stack("wk").astype(jnp.bfloat16),
        "wv": stack("wv").astype(jnp.bfloat16),
        "wh": stack("wh").astype(jnp.bfloat16),
        "w1": stack("w1").astype(jnp.bfloat16),
        "w2": stack("w2").astype(jnp.bfloat16),
        "small": small.astype(jnp.float32),
    }


# ---------------------------------------------------------------------------
# Full Encoder forward (Pallas) and pure-JAX f32 reference
# ---------------------------------------------------------------------------
@functools.partial(jax.jit, static_argnames=("num_heads", "batch_tile"))
def encoder_forward(input_ids, params, num_heads, batch_tile=None):
    # Embedding lookup + pos-emb + LN(1e-12): pure gather/elementwise glue,
    # done in plain JAX so nothing sits resident in VMEM for all layers.
    we = jnp.take(params["word_emb"], input_ids, axis=0)        # (B, S, D)
    S = input_ids.shape[1]
    x0 = _layer_norm(we + params["pos_emb"][:S],
                     params["emb_ln_g"], params["emb_ln_b"], 1e-12)
    packed = pack_layer_params(params["layers"])
    return encoder_pallas(x0, packed, num_heads, batch_tile=batch_tile)


def encoder_reference(input_ids, params, num_heads):
    we = jnp.take(params["word_emb"], input_ids, axis=0)
    S = input_ids.shape[1]
    x = _layer_norm(we + params["pos_emb"][:S],
                    params["emb_ln_g"], params["emb_ln_b"], 1e-12)
    B, _, D = x.shape
    d_k = D // num_heads
    for lp in params["layers"]:
        q = x @ lp["wq"]
        k = x @ lp["wk"]
        v = x @ lp["wv"]

        def split(t):
            return t.reshape(B, S, num_heads, d_k).transpose(0, 2, 1, 3)

        qh = split(q) / np.sqrt(d_k)
        kh, vh = split(k), split(v)
        s = jnp.einsum("bhqd,bhkd->bhqk", qh, kh)
        p = jax.nn.softmax(s, axis=-1)
        hcat = jnp.einsum("bhqk,bhkd->bhqd", p, vh).transpose(0, 2, 1, 3).reshape(B, S, D)
        attn = hcat @ lp["wh"] + lp["bh"]
        out1 = _layer_norm(x + attn, lp["ln1_g"], lp["ln1_b"], 1e-6)
        hid = jax.nn.relu(out1 @ lp["w1"] + lp["b1"])
        ffn = hid @ lp["w2"] + lp["b2"]
        x = _layer_norm(out1 + ffn, lp["ln2_g"], lp["ln2_b"], 1e-6)
    return x


# ---------------------------------------------------------------------------
if __name__ == "__main__":
    # Small config consistent with the module.
    B, S = 2, 8
    num_layers = 2
    d_model = 32
    num_heads = 2
    ff_hidden = 64
    vocab = 50
    max_pos = 16

    key = jax.random.PRNGKey(0)
    k_ids, k_params = jax.random.split(key)

    input_ids = jax.random.randint(k_ids, (B, S), 0, vocab, jnp.int32)
    # Include a padding token (padding_idx=1 -> zero embedding row); like the
    # reference module, no attention mask is applied for padding tokens.
    input_ids = input_ids.at[0, -1].set(1)

    params = init_params(k_params, num_layers, d_model, ff_hidden, vocab, max_pos)

    out = encoder_forward(input_ids, params, num_heads=num_heads)
    out = jax.block_until_ready(out)
    assert out.shape == (B, S, d_model)
    assert bool(jnp.all(jnp.isfinite(out)))

    # Check against a pure-JAX f32 reference (kernel uses bf16 MXU inputs and
    # an approximate softmax reciprocal, so the tolerance is loose).
    ref = encoder_reference(input_ids, params, num_heads)
    max_diff = float(jnp.max(jnp.abs(out - ref)))
    assert max_diff < 0.2, f"kernel/reference mismatch: {max_diff}"

    print("KERNEL_OK")
</pallas_src>

<mosaic_0001>
module attributes {stable_mosaic.version = 11 : i64} {
  func.func @encoder_kernel(%arg0: i32, %arg1: i32, %arg2: memref<1x8x32xf32, #tpu.memory_space<vmem>>, %arg3: memref<1x32x32xbf16, #tpu.memory_space<vmem>>, %arg4: memref<1x32x32xbf16, #tpu.memory_space<vmem>>, %arg5: memref<1x32x32xbf16, #tpu.memory_space<vmem>>, %arg6: memref<1x32x32xbf16, #tpu.memory_space<vmem>>, %arg7: memref<1x32x64xbf16, #tpu.memory_space<vmem>>, %arg8: memref<1x64x32xbf16, #tpu.memory_space<vmem>>, %arg9: memref<1x8x64xf32, #tpu.memory_space<vmem>>, %arg10: memref<1x8x32xf32, #tpu.memory_space<vmem>>, %arg11: memref<8x32xf32, #tpu.memory_space<vmem>>) attributes {dimension_semantics = [#tpu.dimension_semantics<parallel>, #tpu.dimension_semantics<arbitrary>], iteration_bounds = array<i64: 2, 2>, scalar_prefetch = 0 : i64, scratch_operands = 1 : i64, tpu.core_type = #tpu.core_type<tc>, window_params = [{transform_indices = @transform_0, window_bounds = array<i64: 1, 8, 32>}, {transform_indices = @transform_1, window_bounds = array<i64: 1, 32, 32>}, {transform_indices = @transform_2, window_bounds = array<i64: 1, 32, 32>}, {transform_indices = @transform_3, window_bounds = array<i64: 1, 32, 32>}, {transform_indices = @transform_4, window_bounds = array<i64: 1, 32, 32>}, {transform_indices = @transform_5, window_bounds = array<i64: 1, 32, 64>}, {transform_indices = @transform_6, window_bounds = array<i64: 1, 64, 32>}, {transform_indices = @transform_7, window_bounds = array<i64: 1, 8, 64>}, {transform_indices = @transform_8, window_bounds = array<i64: 1, 8, 32>}]} {
    %c0_i32 = arith.constant 0 : i32
    %0 = arith.cmpi eq, %arg1, %c0_i32 : i32
    %1 = arith.extui %0 : i1 to i32
    %c0_i32_0 = arith.constant 0 : i32
    %2 = arith.cmpi ne, %1, %c0_i32_0 : i32
    scf.if %2 {
      %c0_57 = arith.constant 0 : index
      %c0_58 = arith.constant 0 : index
      %c0_59 = arith.constant 0 : index
      %140 = vector.load %arg2[%c0_57, %c0_58, %c0_59] : memref<1x8x32xf32, #tpu.memory_space<vmem>>, vector<1x8x32xf32>
      %c0_60 = arith.constant 0 : index
      %c0_61 = arith.constant 0 : index
      %c0_62 = arith.constant 0 : index
      %141 = vector.load %arg10[%c0_60, %c0_61, %c0_62] : memref<1x8x32xf32, #tpu.memory_space<vmem>>, vector<1x8x32xf32>
      tpu.vector_store %arg10[%c0_60, %c0_61, %c0_62], %140 {strides = array<i32>} : memref<1x8x32xf32, #tpu.memory_space<vmem>>, vector<1x8x32xf32>,
    } else {
    }
    %c0 = arith.constant 0 : index
    %c0_1 = arith.constant 0 : index
    %c0_2 = arith.constant 0 : index
    %3 = vector.load %arg10[%c0, %c0_1, %c0_2] : memref<1x8x32xf32, #tpu.memory_space<vmem>>, vector<1x8x32xf32>
    %4 = vector.shape_cast %3 : vector<1x8x32xf32> to vector<8x32xf32>
    %5 = arith.truncf %4 : vector<8x32xf32> to vector<8x32xbf16>
    %c0_3 = arith.constant 0 : index
    %c0_4 = arith.constant 0 : index
    %c0_5 = arith.constant 0 : index
    %6 = vector.load %arg9[%c0_3, %c0_4, %c0_5] : memref<1x8x64xf32, #tpu.memory_space<vmem>>, vector<1x8x64xf32>
    %7 = vector.shape_cast %6 : vector<1x8x64xf32> to vector<8x64xf32>
    %8 = vector.extract_strided_slice %7 {offsets = [0, 0], sizes = [1, 32], strides = [1, 1]} : vector<8x64xf32> to vector<1x32xf32>
    %9 = vector.extract_strided_slice %7 {offsets = [1, 0], sizes = [1, 64], strides = [1, 1]} : vector<8x64xf32> to vector<1x64xf32>
    %10 = vector.extract_strided_slice %7 {offsets = [2, 0], sizes = [1, 32], strides = [1, 1]} : vector<8x64xf32> to vector<1x32xf32>
    %11 = vector.extract_strided_slice %7 {offsets = [3, 0], sizes = [1, 32], strides = [1, 1]} : vector<8x64xf32> to vector<1x32xf32>
    %12 = vector.extract_strided_slice %7 {offsets = [4, 0], sizes = [1, 32], strides = [1, 1]} : vector<8x64xf32> to vector<1x32xf32>
    %13 = vector.extract_strided_slice %7 {offsets = [5, 0], sizes = [1, 32], strides = [1, 1]} : vector<8x64xf32> to vector<1x32xf32>
    %14 = vector.extract_strided_slice %7 {offsets = [6, 0], sizes = [1, 32], strides = [1, 1]} : vector<8x64xf32> to vector<1x32xf32>
    %c0_6 = arith.constant 0 : index
    %c0_7 = arith.constant 0 : index
    %c0_8 = arith.constant 0 : index
    %15 = vector.load %arg3[%c0_6, %c0_7, %c0_8] : memref<1x32x32xbf16, #tpu.memory_space<vmem>>, vector<1x32x32xbf16>
    %16 = vector.shape_cast %15 : vector<1x32x32xbf16> to vector<32x32xbf16>
    %cst = arith.constant dense<0.000000e+00> : vector<8x32xf32>
    %17 = tpu.matmul %5, %16, %cst {dimension_numbers = #tpu.dot_dimension_numbers<[1], [0], [0], [1], [0, 0, 1, 1], [], []>} : vector<8x32xbf16>, vector<32x32xbf16>, vector<8x32xf32> -> vector<8x32xf32>
    %cst_9 = arith.constant 2.500000e-01 : f32
    %18 = vector.broadcast %cst_9 : f32 to vector<8x32xf32>
    %19 = arith.mulf %17, %18 : vector<8x32xf32>
    %20 = arith.truncf %19 : vector<8x32xf32> to vector<8x32xbf16>
    %c0_10 = arith.constant 0 : index
    %c0_11 = arith.constant 0 : index
    %c0_12 = arith.constant 0 : index
    %21 = vector.load %arg4[%c0_10, %c0_11, %c0_12] : memref<1x32x32xbf16, #tpu.memory_space<vmem>>, vector<1x32x32xbf16>
    %22 = vector.shape_cast %21 : vector<1x32x32xbf16> to vector<32x32xbf16>
    %cst_13 = arith.constant dense<0.000000e+00> : vector<8x32xf32>
    %23 = tpu.matmul %5, %22, %cst_13 {dimension_numbers = #tpu.dot_dimension_numbers<[1], [0], [0], [1], [0, 0, 1, 1], [], []>} : vector<8x32xbf16>, vector<32x32xbf16>, vector<8x32xf32> -> vector<8x32xf32>
    %24 = arith.truncf %23 : vector<8x32xf32> to vector<8x32xbf16>
    %c0_14 = arith.constant 0 : index
    %c0_15 = arith.constant 0 : index
    %c0_16 = arith.constant 0 : index
    %25 = vector.load %arg5[%c0_14, %c0_15, %c0_16] : memref<1x32x32xbf16, #tpu.memory_space<vmem>>, vector<1x32x32xbf16>
    %26 = vector.shape_cast %25 : vector<1x32x32xbf16> to vector<32x32xbf16>
    %cst_17 = arith.constant dense<0.000000e+00> : vector<8x32xf32>
    %27 = tpu.matmul %5, %26, %cst_17 {dimension_numbers = #tpu.dot_dimension_numbers<[1], [0], [0], [1], [0, 0, 1, 1], [], []>} : vector<8x32xbf16>, vector<32x32xbf16>, vector<8x32xf32> -> vector<8x32xf32>
    %28 = arith.truncf %27 : vector<8x32xf32> to vector<8x32xbf16>
    %29 = vector.extract_strided_slice %20 {offsets = [0, 0], sizes = [8, 16], strides = [1, 1]} : vector<8x32xbf16> to vector<8x16xbf16>
    %30 = vector.shape_cast %29 : vector<8x16xbf16> to vector<1x8x16xbf16>
    %31 = vector.extract_strided_slice %24 {offsets = [0, 0], sizes = [8, 16], strides = [1, 1]} : vector<8x32xbf16> to vector<8x16xbf16>
    %32 = vector.shape_cast %31 : vector<8x16xbf16> to vector<1x8x16xbf16>
    %33 = vector.extract_strided_slice %28 {offsets = [0, 0], sizes = [8, 16], strides = [1, 1]} : vector<8x32xbf16> to vector<8x16xbf16>
    %34 = vector.shape_cast %33 : vector<8x16xbf16> to vector<1x8x16xbf16>
    "tpu.trace_start"() <{level = 10 : i32, message = "bqd,bkd->bqk"}> : () -> ()
    %cst_18 = arith.constant dense<0.000000e+00> : vector<1x8x8xf32>
    %35 = tpu.matmul %30, %32, %cst_18 {dimension_numbers = #tpu.dot_dimension_numbers<[2], [2], [1], [1], [0, 0, 0, 1, 1, 1], [0], [0]>} : vector<1x8x16xbf16>, vector<1x8x16xbf16>, vector<1x8x8xf32> -> vector<1x8x8xf32>
    "tpu.trace_stop"() : () -> ()
    %cst_19 = arith.constant dense<0xFF800000> : vector<1x8xf32>
    %36 = vector.multi_reduction <maximumf>, %35, %cst_19 [2] : vector<1x8x8xf32> to vector<1x8xf32>
    %37 = vector.shape_cast %36 : vector<1x8xf32> to vector<1x8x1xf32>
    %38 = vector.broadcast %37 : vector<1x8x1xf32> to vector<1x8x8xf32>
    %39 = arith.subf %35, %38 : vector<1x8x8xf32>
    %40 = math.exp %39 : vector<1x8x8xf32>
    %cst_20 = arith.constant dense<0.000000e+00> : vector<1x8xf32>
    %41 = vector.multi_reduction <add>, %40, %cst_20 [2] : vector<1x8x8xf32> to vector<1x8xf32>
    %42 = vector.shape_cast %41 : vector<1x8xf32> to vector<1x8x1xf32>
    %43 = tpu.reciprocal %42 {approx = true} : vector<1x8x1xf32> -> vector<1x8x1xf32>
    %44 = vector.broadcast %43 : vector<1x8x1xf32> to vector<1x8x8xf32>
    %45 = arith.mulf %40, %44 : vector<1x8x8xf32>
    %46 = arith.truncf %45 : vector<1x8x8xf32> to vector<1x8x8xbf16>
    "tpu.trace_start"() <{level = 10 : i32, message = "bqk,bkd->bqd"}> : () -> ()
    %cst_21 = arith.constant dense<0.000000e+00> : vector<1x8x16xf32>
    %47 = tpu.matmul %46, %34, %cst_21 {dimension_numbers = #tpu.dot_dimension_numbers<[2], [1], [1], [2], [0, 0, 0, 1, 1, 2], [0], [0]>} : vector<1x8x8xbf16>, vector<1x8x16xbf16>, vector<1x8x16xf32> -> vector<1x8x16xf32>
    "tpu.trace_stop"() : () -> ()
    %48 = vector.shape_cast %47 : vector<1x8x16xf32> to vector<8x16xf32>
    %c0_22 = arith.constant 0 : index
    %c0_23 = arith.constant 0 : index
    %49 = vector.load %arg11[%c0_22, %c0_23] : memref<8x32xf32, #tpu.memory_space<vmem>>, vector<8x16xf32>
    tpu.vector_store %arg11[%c0_22, %c0_23], %48 {strides = array<i32>} : memref<8x32xf32, #tpu.memory_space<vmem>>, vector<8x16xf32>,
    %50 = vector.extract_strided_slice %20 {offsets = [0, 16], sizes = [8, 16], strides = [1, 1]} : vector<8x32xbf16> to vector<8x16xbf16>
    %51 = vector.shape_cast %50 : vector<8x16xbf16> to vector<1x8x16xbf16>
    %52 = vector.extract_strided_slice %24 {offsets = [0, 16], sizes = [8, 16], strides = [1, 1]} : vector<8x32xbf16> to vector<8x16xbf16>
    %53 = vector.shape_cast %52 : vector<8x16xbf16> to vector<1x8x16xbf16>
    %54 = vector.extract_strided_slice %28 {offsets = [0, 16], sizes = [8, 16], strides = [1, 1]} : vector<8x32xbf16> to vector<8x16xbf16>
    %55 = vector.shape_cast %54 : vector<8x16xbf16> to vector<1x8x16xbf16>
    "tpu.trace_start"() <{level = 10 : i32, message = "bqd,bkd->bqk"}> : () -> ()
    %cst_24 = arith.constant dense<0.000000e+00> : vector<1x8x8xf32>
    %56 = tpu.matmul %51, %53, %cst_24 {dimension_numbers = #tpu.dot_dimension_numbers<[2], [2], [1], [1], [0, 0, 0, 1, 1, 1], [0], [0]>} : vector<1x8x16xbf16>, vector<1x8x16xbf16>, vector<1x8x8xf32> -> vector<1x8x8xf32>
    "tpu.trace_stop"() : () -> ()
    %cst_25 = arith.constant dense<0xFF800000> : vector<1x8xf32>
    %57 = vector.multi_reduction <maximumf>, %56, %cst_25 [2] : vector<1x8x8xf32> to vector<1x8xf32>
    %58 = vector.shape_cast %57 : vector<1x8xf32> to vector<1x8x1xf32>
    %59 = vector.broadcast %58 : vector<1x8x1xf32> to vector<1x8x8xf32>
    %60 = arith.subf %56, %59 : vector<1x8x8xf32>
    %61 = math.exp %60 : vector<1x8x8xf32>
    %cst_26 = arith.constant dense<0.000000e+00> : vector<1x8xf32>
    %62 = vector.multi_reduction <add>, %61, %cst_26 [2] : vector<1x8x8xf32> to vector<1x8xf32>
    %63 = vector.shape_cast %62 : vector<1x8xf32> to vector<1x8x1xf32>
    %64 = tpu.reciprocal %63 {approx = true} : vector<1x8x1xf32> -> vector<1x8x1xf32>
    %65 = vector.broadcast %64 : vector<1x8x1xf32> to vector<1x8x8xf32>
    %66 = arith.mulf %61, %65 : vector<1x8x8xf32>
    %67 = arith.truncf %66 : vector<1x8x8xf32> to vector<1x8x8xbf16>
    "tpu.trace_start"() <{level = 10 : i32, message = "bqk,bkd->bqd"}> : () -> ()
    %cst_27 = arith.constant dense<0.000000e+00> : vector<1x8x16xf32>
    %68 = tpu.matmul %67, %55, %cst_27 {dimension_numbers = #tpu.dot_dimension_numbers<[2], [1], [1], [2], [0, 0, 0, 1, 1, 2], [0], [0]>} : vector<1x8x8xbf16>, vector<1x8x16xbf16>, vector<1x8x16xf32> -> vector<1x8x16xf32>
    "tpu.trace_stop"() : () -> ()
    %69 = vector.shape_cast %68 : vector<1x8x16xf32> to vector<8x16xf32>
    %c0_28 = arith.constant 0 : index
    %c16 = arith.constant 16 : index
    %70 = vector.load %arg11[%c0_28, %c16] : memref<8x32xf32, #tpu.memory_space<vmem>>, vector<8x16xf32>
    tpu.vector_store %arg11[%c0_28, %c16], %69 {strides = array<i32>} : memref<8x32xf32, #tpu.memory_space<vmem>>, vector<8x16xf32>,
    %c0_29 = arith.constant 0 : index
    %c0_30 = arith.constant 0 : index
    %71 = vector.load %arg11[%c0_29, %c0_30] : memref<8x32xf32, #tpu.memory_space<vmem>>, vector<8x32xf32>
    %72 = arith.truncf %71 : vector<8x32xf32> to vector<8x32xbf16>
    %c0_31 = arith.constant 0 : index
    %c0_32 = arith.constant 0 : index
    %c0_33 = arith.constant 0 : index
    %73 = vector.load %arg6[%c0_31, %c0_32, %c0_33] : memref<1x32x32xbf16, #tpu.memory_space<vmem>>, vector<1x32x32xbf16>
    %74 = vector.shape_cast %73 : vector<1x32x32xbf16> to vector<32x32xbf16>
    %cst_34 = arith.constant dense<0.000000e+00> : vector<8x32xf32>
    %75 = tpu.matmul %72, %74, %cst_34 {dimension_numbers = #tpu.dot_dimension_numbers<[1], [0], [0], [1], [0, 0, 1, 1], [], []>} : vector<8x32xbf16>, vector<32x32xbf16>, vector<8x32xf32> -> vector<8x32xf32>
    %76 = vector.broadcast %8 : vector<1x32xf32> to vector<8x32xf32>
    %77 = arith.addf %75, %76 : vector<8x32xf32>
    %78 = arith.addf %4, %77 : vector<8x32xf32>
    %cst_35 = arith.constant dense<0.000000e+00> : vector<8xf32>
    %79 = vector.multi_reduction <add>, %78, %cst_35 [1] : vector<8x32xf32> to vector<8xf32>
    %80 = vector.shape_cast %79 : vector<8xf32> to vector<8x1xf32>
    %cst_36 = arith.constant 3.200000e+01 : f32
    %81 = vector.broadcast %cst_36 : f32 to vector<8x1xf32>
    %82 = arith.divf %80, %81 : vector<8x1xf32>
    %83 = vector.broadcast %82 : vector<8x1xf32> to vector<8x32xf32>
    %84 = arith.subf %78, %83 : vector<8x32xf32>
    %85 = arith.mulf %84, %84 : vector<8x32xf32>
    %cst_37 = arith.constant dense<0.000000e+00> : vector<8xf32>
    %86 = vector.multi_reduction <add>, %85, %cst_37 [1] : vector<8x32xf32> to vector<8xf32>
    %87 = vector.shape_cast %86 : vector<8xf32> to vector<8x1xf32>
    %cst_38 = arith.constant 3.200000e+01 : f32
    %88 = vector.broadcast %cst_38 : f32 to vector<8x1xf32>
    %89 = arith.divf %87, %88 : vector<8x1xf32>
    %90 = vector.broadcast %82 : vector<8x1xf32> to vector<8x32xf32>
    %91 = arith.subf %78, %90 : vector<8x32xf32>
    %cst_39 = arith.constant 9.99999997E-7 : f32
    %92 = vector.broadcast %cst_39 : f32 to vector<8x1xf32>
    %93 = arith.addf %89, %92 : vector<8x1xf32>
    %94 = math.rsqrt %93 : vector<8x1xf32>
    %95 = vector.broadcast %94 : vector<8x1xf32> to vector<8x32xf32>
    %96 = arith.mulf %91, %95 : vector<8x32xf32>
    %97 = vector.broadcast %11 : vector<1x32xf32> to vector<8x32xf32>
    %98 = arith.mulf %96, %97 : vector<8x32xf32>
    %99 = vector.broadcast %12 : vector<1x32xf32> to vector<8x32xf32>
    %100 = arith.addf %98, %99 : vector<8x32xf32>
    %101 = arith.truncf %100 : vector<8x32xf32> to vector<8x32xbf16>
    %c0_40 = arith.constant 0 : index
    %c0_41 = arith.constant 0 : index
    %c0_42 = arith.constant 0 : index
    %102 = vector.load %arg7[%c0_40, %c0_41, %c0_42] : memref<1x32x64xbf16, #tpu.memory_space<vmem>>, vector<1x32x64xbf16>
    %103 = vector.shape_cast %102 : vector<1x32x64xbf16> to vector<32x64xbf16>
    %cst_43 = arith.constant dense<0.000000e+00> : vector<8x64xf32>
    %104 = tpu.matmul %101, %103, %cst_43 {dimension_numbers = #tpu.dot_dimension_numbers<[1], [0], [0], [1], [0, 0, 1, 1], [], []>} : vector<8x32xbf16>, vector<32x64xbf16>, vector<8x64xf32> -> vector<8x64xf32>
    %105 = vector.broadcast %9 : vector<1x64xf32> to vector<8x64xf32>
    %106 = arith.addf %104, %105 : vector<8x64xf32>
    %cst_44 = arith.constant 0.000000e+00 : f32
    %107 = vector.broadcast %cst_44 : f32 to vector<8x64xf32>
    %108 = arith.maximumf %106, %107 : vector<8x64xf32>
    %109 = arith.truncf %108 : vector<8x64xf32> to vector<8x64xbf16>
    %c0_45 = arith.constant 0 : index
    %c0_46 = arith.constant 0 : index
    %c0_47 = arith.constant 0 : index
    %110 = vector.load %arg8[%c0_45, %c0_46, %c0_47] : memref<1x64x32xbf16, #tpu.memory_space<vmem>>, vector<1x64x32xbf16>
    %111 = vector.shape_cast %110 : vector<1x64x32xbf16> to vector<64x32xbf16>
    %cst_48 = arith.constant dense<0.000000e+00> : vector<8x32xf32>
    %112 = tpu.matmul %109, %111, %cst_48 {dimension_numbers = #tpu.dot_dimension_numbers<[1], [0], [0], [1], [0, 0, 1, 1], [], []>} : vector<8x64xbf16>, vector<64x32xbf16>, vector<8x32xf32> -> vector<8x32xf32>
    %113 = vector.broadcast %10 : vector<1x32xf32> to vector<8x32xf32>
    %114 = arith.addf %112, %113 : vector<8x32xf32>
    %115 = arith.addf %100, %114 : vector<8x32xf32>
    %cst_49 = arith.constant dense<0.000000e+00> : vector<8xf32>
    %116 = vector.multi_reduction <add>, %115, %cst_49 [1] : vector<8x32xf32> to vector<8xf32>
    %117 = vector.shape_cast %116 : vector<8xf32> to vector<8x1xf32>
    %cst_50 = arith.constant 3.200000e+01 : f32
    %118 = vector.broadcast %cst_50 : f32 to vector<8x1xf32>
    %119 = arith.divf %117, %118 : vector<8x1xf32>
    %120 = vector.broadcast %119 : vector<8x1xf32> to vector<8x32xf32>
    %121 = arith.subf %115, %120 : vector<8x32xf32>
    %122 = arith.mulf %121, %121 : vector<8x32xf32>
    %cst_51 = arith.constant dense<0.000000e+00> : vector<8xf32>
    %123 = vector.multi_reduction <add>, %122, %cst_51 [1] : vector<8x32xf32> to vector<8xf32>
    %124 = vector.shape_cast %123 : vector<8xf32> to vector<8x1xf32>
    %cst_52 = arith.constant 3.200000e+01 : f32
    %125 = vector.broadcast %cst_52 : f32 to vector<8x1xf32>
    %126 = arith.divf %124, %125 : vector<8x1xf32>
    %127 = vector.broadcast %119 : vector<8x1xf32> to vector<8x32xf32>
    %128 = arith.subf %115, %127 : vector<8x32xf32>
    %cst_53 = arith.constant 9.99999997E-7 : f32
    %129 = vector.broadcast %cst_53 : f32 to vector<8x1xf32>
    %130 = arith.addf %126, %129 : vector<8x1xf32>
    %131 = math.rsqrt %130 : vector<8x1xf32>
    %132 = vector.broadcast %131 : vector<8x1xf32> to vector<8x32xf32>
    %133 = arith.mulf %128, %132 : vector<8x32xf32>
    %134 = vector.broadcast %13 : vector<1x32xf32> to vector<8x32xf32>
    %135 = arith.mulf %133, %134 : vector<8x32xf32>
    %136 = vector.broadcast %14 : vector<1x32xf32> to vector<8x32xf32>
    %137 = arith.addf %135, %136 : vector<8x32xf32>
    %138 = vector.shape_cast %137 : vector<8x32xf32> to vector<1x8x32xf32>
    %c0_54 = arith.constant 0 : index
    %c0_55 = arith.constant 0 : index
    %c0_56 = arith.constant 0 : index
    %139 = vector.load %arg10[%c0_54, %c0_55, %c0_56] : memref<1x8x32xf32, #tpu.memory_space<vmem>>, vector<1x8x32xf32>
    tpu.vector_store %arg10[%c0_54, %c0_55, %c0_56], %138 {strides = array<i32>} : memref<1x8x32xf32, #tpu.memory_space<vmem>>, vector<1x8x32xf32>,
    return
  }
  func.func @transform_0(%arg0: i32, %arg1: i32) -> (i32, i32, i32) {
    %c0_i32 = arith.constant 0 : i32
    %c0_i32_0 = arith.constant 0 : i32
    %c0_i32_1 = arith.constant 0 : i32
    return %arg0, %c0_i32, %c0_i32_0 : i32, i32, i32
  }
  func.func @transform_1(%arg0: i32, %arg1: i32) -> (i32, i32, i32) {
    %c0_i32 = arith.constant 0 : i32
    %c0_i32_0 = arith.constant 0 : i32
    %c0_i32_1 = arith.constant 0 : i32
    return %arg1, %c0_i32, %c0_i32_0 : i32, i32, i32
  }
  func.func @transform_2(%arg0: i32, %arg1: i32) -> (i32, i32, i32) {
    %c0_i32 = arith.constant 0 : i32
    %c0_i32_0 = arith.constant 0 : i32
    %c0_i32_1 = arith.constant 0 : i32
    return %arg1, %c0_i32, %c0_i32_0 : i32, i32, i32
  }
  func.func @transform_3(%arg0: i32, %arg1: i32) -> (i32, i32, i32) {
    %c0_i32 = arith.constant 0 : i32
    %c0_i32_0 = arith.constant 0 : i32
    %c0_i32_1 = arith.constant 0 : i32
    return %arg1, %c0_i32, %c0_i32_0 : i32, i32, i32
  }
  func.func @transform_4(%arg0: i32, %arg1: i32) -> (i32, i32, i32) {
    %c0_i32 = arith.constant 0 : i32
    %c0_i32_0 = arith.constant 0 : i32
    %c0_i32_1 = arith.constant 0 : i32
    return %arg1, %c0_i32, %c0_i32_0 : i32, i32, i32
  }
  func.func @transform_5(%arg0: i32, %arg1: i32) -> (i32, i32, i32) {
    %c0_i32 = arith.constant 0 : i32
    %c0_i32_0 = arith.constant 0 : i32
    %c0_i32_1 = arith.constant 0 : i32
    return %arg1, %c0_i32, %c0_i32_0 : i32, i32, i32
  }
  func.func @transform_6(%arg0: i32, %arg1: i32) -> (i32, i32, i32) {
    %c0_i32 = arith.constant 0 : i32
    %c0_i32_0 = arith.constant 0 : i32
    %c0_i32_1 = arith.constant 0 : i32
    return %arg1, %c0_i32, %c0_i32_0 : i32, i32, i32
  }
  func.func @transform_7(%arg0: i32, %arg1: i32) -> (i32, i32, i32) {
    %c0_i32 = arith.constant 0 : i32
    %c0_i32_0 = arith.constant 0 : i32
    %c0_i32_1 = arith.constant 0 : i32
    return %arg1, %c0_i32, %c0_i32_0 : i32, i32, i32
  }
  func.func @transform_8(%arg0: i32, %arg1: i32) -> (i32, i32, i32) {
    %c0_i32 = arith.constant 0 : i32
    %c0_i32_0 = arith.constant 0 : i32
    %c0_i32_1 = arith.constant 0 : i32
    return %arg0, %c0_i32, %c0_i32_0 : i32, i32, i32
  }
}

</mosaic_0001>

<bundles_post_ra>
// kernel: encoder_forward.1
= control target key start
LH: loop header
LB: loop body
LE: loop exit
PB: predicated region body
PF: predicated region fallthrough
CT: control target
= control target key end

     0   :  { %s2060_s0 = inlined_call_operand.hbm [shape: f32[2,8,32], index: 0, kind: input, shape index: {}, may-alias: {0,8}]   ;;  %s2061_s1 = inlined_call_operand.vmem [shape: bf16[2,32,32], index: 1, kind: input, shape index: {}]   ;;  %s2062_s2 = inlined_call_operand.vmem [shape: bf16[2,32,32], index: 2, kind: input, shape index: {}]   ;;  %s2063_s3 = inlined_call_operand.vmem [shape: bf16[2,32,32], index: 3, kind: input, shape index: {}]   ;;  %s2064_s4 = inlined_call_operand.vmem [shape: bf16[2,32,32], index: 4, kind: input, shape index: {}]   ;;  %s2065_s5 = inlined_call_operand.vmem [shape: bf16[2,32,64], index: 5, kind: input, shape index: {}]   ;;  %s2066_s6 = inlined_call_operand.vmem [shape: bf16[2,64,32], index: 6, kind: input, shape index: {}]   ;;  %s2067_s7 = inlined_call_operand.vmem [shape: f32[2,8,64], index: 7, kind: input, shape index: {}]   ;;  %s2068_s8 = inlined_call_operand.hbm [shape: f32[2,8,32], index: 8, kind: output, shape index: {}, may-alias: {0,8}]  }
   0x1   :  { %2079 = sst [smem:[#allocation19_spill]] %s2060_s0 }
   0x2   :  { %2080 = sst [smem:[#allocation20_spill]] %s2061_s1 }
   0x3   :  { %2081 = sst [smem:[#allocation21_spill]] %s2062_s2 }
   0x4   :  { %2082 = sst [smem:[#allocation22_spill]] %s2068_s8 }
   0x5   :  { %13 = vsyncpa [#allocation4], 0 }
   0x6   :  { %15 = vsyncpa [#allocation4 + $0x1], 0 }
   0x7   :  { %16 = vsyncpa [#allocation5], 0 }
   0x8   :  { %18 = vsyncpa [#allocation5 + $0x1], 0  ;;  %s1770_s27 = smov 0   ;;  %s1772_s28 = smov 0  }
   0x9   :  { %s1774_s29 = smov 0   ;;  %s1776_s30 = smov 0  }
   0xa   :  { %s1778_s9 = smov 0   ;;  %s1780_s10 = smov 0  }
   0xb   :  { %s1782_s11 = smov 0   ;;  %s1784_s12 = smov 0  }
   0xc LB: > { %2083 = sst [smem:[#allocation9_spill]] %s1689_s27  ;;  %s1324_s13 = sadd.s32 4294967295, %s1717_s12   ;;  %s1717_s12 = sphi %s1784_s12, %s24_s12   ;;  %s1713_s11 = sphi %s1782_s11, %s2113_s11   ;;  %s1709_s10 = sphi %s1780_s10, %s2112_s10   ;;  %s1705_s9 = sphi %s1778_s9, %s2111_s9   ;;  %s1701_s30 = sphi %s1776_s30, %s2110_s30   ;;  %s1697_s29 = sphi %s1774_s29, %s2109_s29   ;;  %s1693_s28 = sphi %s1772_s28, %s2108_s28   ;;  %s1689_s27 = sphi %s1770_s27, %s2107_s27  }
   0xd   : > { %2084 = sst [smem:[#allocation10_spill]] %s1693_s28  ;;  %s1325_s14 = sadd.s32 4294967294, %s1717_s12  }
   0xe   : > { %2085 = sst [smem:[#allocation11_spill]] %s1697_s29  ;;  %s33_s15 = sadd.s32 1, %s1709_s10 }
   0xf   : > { %2086 = sst [smem:[#allocation12_spill]] %s1709_s10  ;;  %s36_s16 = sadd.s32 1, %s1713_s11 }
  0x10   : > { %2087 = sst [smem:[#allocation13_spill]] %s1713_s11  ;;  %p34_p0 = scmp.ge.s32.totalorder %s33_s15, 2 }
  0x11   : > { %2088 = sst [smem:[#allocation14_spill]] %s1717_s12  ;;  %s43_s17 = sadd.s32 1, %s1697_s29 }
  0x12   : > { %p50_p1 = scmp.ne.s32.totalorder %s1697_s29, %s1693_s28  ;;  %p51_p2 = scmp.eq.s32.totalorder %s1717_s12, 0 }
  0x13   : > { %s2115_s15 = smov (%p34_p0, %s33_s15), 0  ;;  %s2117_s16 = smov (!%p34_p0, %s36_s16), %s1713_s11 }
  0x14   : > { %2089 = sst [smem:[#allocation15_spill]] %s2115_s15  ;;  %p1821_p3 = por %p51_p2, %p50_p1 }
  0x15   : > { %p56_p4 = scmp.ne.s32.totalorder %s1693_s28, %s1689_s27  ;;  %p38_p5 = scmp.ge.s32.totalorder %s2117_s16, 2 }
  0x16   : > { %p57_p6 = scmp.eq.s32.totalorder %s1324_s13, 0  ;;  %p262_p7 = scmp.eq.s32.totalorder %s1324_s13, 3 }
  0x17   : > { %p268_p8 = scmp.eq.s32.totalorder %s1325_s14, 3  ;;  %s2119_s16 = smov (%p38_p5, %s2117_s16), 0 }
  0x18   : > { %2091 = sst [smem:[#allocation16_spill]] %s2119_s16  ;;  %p1829_p9 = por %p57_p6, %p56_p4 }
  0x19   : > { %p1833_p10 = por %p262_p7, %p50_p1  ;;  %s40_s21 = ssub.s32 %s1713_s11, %s2119_s16 }
  0x1a   : > { %p1839_p11 = por %p268_p8, %p56_p4  ;;  %p41_p12 = scmp.eq.s32.totalorder %s40_s21, 0 }
  0x1b   : > { %p1497_p13 = scmp.lt.s32.totalorder %s1717_s12, 4  ;;  %s288_s23 = sand.u32 1, %s1697_s29  }
  0x1c   : > { %s2094_s22 = scalar_select %p1839_p11, 1, 0 }
  0x1d   : > { %s1846_s24 = scalar_select %p41_p12, %s1697_s29, %s43_s17  }
  0x1e   : > { %2095 = sst [smem:[#allocation17_spill]] %s2094_s22  ;;  %s1328_s25 = sshll.u32 %s288_s23, 3 }
  0x1f   : > { %2096 = sst [smem:[#allocation18_spill]] %s1846_s24  ;;  %s1329_s26 = sshll.u32 %s1713_s11, 7 }
  0x20   : > { %s2097_s0 = sld [smem:[#allocation19_spill]]  ;;  %s292_s10 = scalar_lea.vmem [#allocation3], %s1328_s25 }
  0x21   : > { %s299_s27 = sshll.u32 %s292_s10, 4  ;;  %p1854_p0 = pnand %p1497_p13, %p1821_p3  ;;  %s300_s27 = int_to_ptr.vmem [resolvable:$true] %s299_s27 }
  0x22   : > { %p1330_p1 = scmp.ge.s32.totalorder %s1717_s12, 1  ;;  %p359_p2 = scmp.lt.s32.totalorder %s1717_s12, 5 }
  0x23   : > { %s289_s21 = scalar_lea.sflag [#allocation4], %s288_s23  ;;  %p1595_p4 = pneg %p1854_p0 }
  0x24   : > { %s1606_s17 = scalar_lea.vmem %s300_s27, 128  ;;  %s1719_s13 = smov [#allocation3]  }
  0x25   : > { %p1607_p5 = scmp.ne.s32.totalorder %s300_s27, %s1606_s17 }
  0x26   : > { %s297_s15 = scalar_lea.hbm %s2097_s0, %s1329_s26  ;;  %s1611_s26 = sshll.u32 %s1719_s13, 4  ;;  %s1612_s26 = int_to_ptr.vmem [resolvable:$false] %s1611_s26 }
  0x27   : > { %p1609_p6 = pnand %p1607_p5, %p1595_p4  ;;  %s1613_s10 = scalar_lea.vmem %s1612_s26, 256 }
  0x28   : > { %p1614_p8 = scmp.lt.s32.totalorder %s300_s27, %s1612_s26  ;;  %p1615_p12 = scmp.lt.s32.totalorder %s1613_s10, %s1606_s17 }
  0x29   : > { %p1610_p7 = pneg %p1609_p6 }
  0x2a   : > { %p1616_p3 = por %p1615_p12, %p1614_p8 }
  0x2c   : > { %p1617_p13 = pnand %p1616_p3, %p1610_p7 }
  0x2e   : > { %1620 = shalt.err (!%p1617_p13)
}
  0x2f   : > { %1492 = dma.hbm_to_vmem [thread:$0]  (!%p1854_p0), %s297_s15, 128, %s300_s27, %s289_s21  }
  0x30   : > { %p360_p11 = pnand %p1330_p1, %p359_p2 }
  0x31   : > { %s1869_s18 = sand.u32 (!%p360_p11), 1, %s1693_s28  }
  0x32   : > { %363 = sbr.rel (%p360_p11) target bundleno = 2448 (0x990), region = 52  ;;  %s1331_s23 = sshll.u32 (!%p360_p11), %s1869_s18, 3 }
  0x33   : > { %s366_s25 = scalar_lea.sflag (!%p360_p11), [#allocation4], %s1869_s18  ;;  %s369_s14 = scalar_lea.vmem (!%p360_p11), [#allocation3], %s1331_s23 }
  0x37   : > { %1680 = dma.done.wait (%p1829_p9), %s366_s25, 128  }
  0x38   : > { %1682 = vsyncadd (%p1829_p9), %s366_s25, 4294967168  ;;  %p436_p0 = scmp.lt.s32.totalorder %s1701_s30, 1  ;;  %s2099_s1 = sld [smem:[#allocation20_spill]] }
  0x39   : > { %s2100_s2 = sld [smem:[#allocation21_spill]]  ;;  %p1346_p9 = scmp.ne.s32.totalorder %s1701_s30, 0 }
  0x3a   : > { %s437_s27 = scalar_select %p436_p0, %s1701_s30, 1 }
  0x3c   : > { %s1375_s15 = sshll.u32 %s437_s27, 4  ;;  %s1380_s16 = sshll.u32 %s437_s27, 5 }
  0x3d   : > { %s1888_s29 = scalar_lea.vmem %s2063_s3, %s1375_s15  ;;  %s1893_s28 = scalar_lea.vmem %s2064_s4, %s1375_s15 }
  0x3e   : > { %s440_s13 = scalar_lea.vmem %s2099_s1, %s1375_s15  ;;  %s1898_s8 = scalar_lea.vmem %s2065_s5, %s1375_s15 }
  0x3f   : > { %s445_s0 = scalar_lea.vmem %s2100_s2, %s1375_s15  ;;  %s1903_s26 = scalar_lea.vmem %s2066_s6, %s1380_s16 }
  0x40   : > { %s1345_s10 = sshll.u32 %s437_s27, 3  ;;  %s1910_s2 = scalar_lea.vmem [#allocation6], %s1331_s23 }
  0x41   : > { %s1908_s24 = scalar_lea.vmem %s2067_s7, %s1345_s10  ;;  %474 = sbr.rel (%p1346_p9) target bundleno = 72 (0x48), region = 60 }
  0x46   : > { %v475_v0 = vld [vmem:[%s369_s14] sm:$0xff]  ;;  %vm476_vm0 = vcmask 261120  }
  0x47   : > { %477 = vst.msk [vmem:[%s1910_s2] sm:$0xff] %vm476_vm0, %v475_v0 }
  0x48 PF: > { %v1567_v1 = vld [vmem:[%s445_s0 + $0x8] sm:$0xff]   ;;  %v1720_v2 = vmov 0.0   ;;  %v1569_v4 = vld [vmem:[%s445_s0] sm:$0xff]   ;;  %vm1721_vm1 = vmmov 0   ;;  %vm497_vm2 = vcmask 261120   ;;  %vm657_vm3 = vcmask 130048  }
  0x49   : > { %1417 = vmatprep.subr.bf16.mxu1 %v1720_v2  ;;  %1409 = vmatprep.subr.bf16.mxu0 %v1720_v2  ;;  %v1568_v3 = vld [vmem:[%s440_s13 + $0x8] sm:$0xff]   ;;  %v1570_v5 = vld [vmem:[%s440_s13] sm:$0xff]   ;;  %s1722_s0 = smov 112   ;;  %vm704_vm4 = vcmask 64512   ;;  %vm720_vm5 = vcmask 1043456   ;;  %s1723_s1 = smov 16  }
  0x4a   : > { %1418 = vmatpush3.bf16.msra.mxu1 %v1567_v1  ;;  %1421 = vmatprep.mubr.msk.bf16.mxu1 %vm1721_vm1, %v1720_v2  ;;  %v1571_v20 = vld [vmem:[%s1888_s29 + $0x8] sm:$0xff]   ;;  %v1572_v21 = vld [vmem:[%s1888_s29] sm:$0xff]   ;;  %vm882_vm6 = vcmask 261248   ;;  %vm1076_vm7 = vcmask 523264   ;;  %s2101_s12 = sld [smem:[#allocation22_spill]]  ;;  %s1146_s14 = scalar_lea.sflag [#allocation5], %s1869_s18 }
  0x4b   : > { %1410 = vmatpush3.bf16.msra.mxu0 %v1568_v3  ;;  %1419 = vmatprep.subr.bf16.mxu1 %v1720_v2  ;;  %v1573_v1 = vld [vmem:[%s1893_s28 + $0x8] sm:$0xff]   ;;  %v1574_v3 = vld [vmem:[%s1893_s28] sm:$0xff]   ;;  %s1159_s28 = sshll.u32 %s1910_s2, 4  ;;  %s1724_s15 = smov [#allocation6]   ;;  %s1160_s28 = int_to_ptr.vmem [resolvable:$true] %s1159_s28 }
  0x4c   : > { %1411 = vmatprep.subr.bf16.mxu0 %v1720_v2  ;;  %1413 = vmatprep.mubr.msk.bf16.mxu0 %vm1721_vm1, %v1720_v2  ;;  %s1621_s27 = scalar_lea.vmem %s1160_s28, 128  ;;  %s1625_s16 = sshll.u32 %s1724_s15, 4  ;;  %s1626_s16 = int_to_ptr.vmem [resolvable:$false] %s1625_s16 }
  0x4d   : > { %p1622_p11 = scmp.ne.s32.totalorder %s1160_s28, %s1621_s27  ;;  %p1628_p4 = scmp.lt.s32.totalorder %s1160_s28, %s1626_s16 }
  0x4e   : > { %v1923_v6 = vld [vmem:[%s1910_s2] sm:$0xff]  ;;  %1420 = vmatpush3.bf16.msra.mxu1 %v1569_v4 }
  0x4f   : > { %v479_v7 = vpack.c.bf16 %v1923_v6, %v1923_v6  ;;  %1412 = vmatpush3.bf16.msra.mxu0 %v1570_v5  ;;  %1433 = vmatprep.subr.bf16.mxu1 %v1720_v2  ;;  %p1623_p1 = pnand %p1622_p11, %p1833_p10 }
  0x50   : > { %1425 = vmatprep.subr.bf16.mxu0 %v1720_v2  ;;  %s2102_s22 = smov %s2101_s12 }
  0x51   : > { %1422 = vmatmul.mubr.msk.bf16.vlgmr.msra.gmra.mxu1 %vm497_vm2, %v479_v7  ;;  %p1624_p2 = pneg %p1623_p1 }
  0x52   : > { %1414 = vmatmul.mubr.msk.bf16.vlgmr.msra.gmra.mxu0 %vm497_vm2, %v479_v7  ;;  %1435 = vmatprep.mubr.msk.bf16.mxu1 %vm1721_vm1, %v1720_v2 }
  0x53   : > { %1429 = vmatprep.mubr.msk.bf16.mxu0 %vm1721_vm1, %v1720_v2  ;;  %1426 = vmatpush3.bf16.msra.mxu0 %v1571_v20 }
  0x54   : > { %1427 = vmatprep.subr.bf16.mxu0 %v1720_v2 }
  0x57   : > { %1428 = vmatpush3.bf16.msra.mxu0 %v1572_v21 }
  0x58   : > { %1439 = vmatprep.subr.bf16.mxu0 %v1720_v2 }
  0x5a   : > { %1430 = vmatmul.mubr.msk.bf16.vlgmr.msra.gmra.mxu0 %vm497_vm2, %v479_v7 }
  0x5b   : > { %1441 = vmatprep.mubr.msk.bf16.mxu0 %vm1721_vm1, %v1720_v2 }
 0x111   : > { %v593_v8 = vpop.f32.mrf.mxu1 }
 0x112   : > { %v599_v9 = vpack.c.bf16 %v593_v8, %v593_v8  ;;  %v535_v10 = vpop.f32.mrf.mxu0 }
 0x113   : > { %v541_v11 = vmul.f32 0.25, %v535_v10  ;;  %v1423_v12 = vpop.f32.mrf.mxu1 }
 0x114   : > { %v662_v13 = vsel %vm657_vm3, %v599_v9, 0  ;;  %769 = vrot.lane.b32.xlu0 %v599_v9, %s1722_s0  ;;  %v1415_v14 = vpop.f32.mrf.mxu0  ;;  %v890_v12 = vlaneseq }
 0x115   : > { %v542_v15 = vpack.c.bf16 %v541_v11, %v541_v11  ;;  %v596_v16 = vpop.f32.mrf.mxu1  ;;  %1434 = vmatpush3.bf16.xpose.msra.mxu1 %v662_v13 }
 0x116   : > { %v538_v17 = vpop.f32.mrf.mxu0  ;;  %1445 = vmatprep.subr.bf16.mxu1 %v1720_v2  ;;  %v1977_v13 = vshrl.u32 %v890_v12, 7 }
 0x117   : > { %v1424_v18 = vpop.f32.mrf.mxu1 }
 0x118   : > { %v1416_v19 = vpop.f32.mrf.mxu0  ;;  %766 = vrot.lane.b32.xlu0 %v542_v15, %s1722_s0  ;;  %v892_v14 = vsub.s32 0, %v1977_v13 }
 0x11a   : > { %v650_v40 = vpop.f32.mrf.mxu0 }
 0x11b   : > { %v656_v41 = vpack.c.bf16 %v650_v40, %v650_v40 }
 0x11c   : > { %1436 = vmatmul.mubr.msk.bf16.vlgmr.msra.gmra.mxu1 %vm657_vm3, %v542_v15  ;;  %v1431_v42 = vpop.f32.mrf.mxu0  ;;  %v1981_v15 = vld [vmem:[%s1908_s24] sm:$0xff] }
 0x11d   : > { %1447 = vmatprep.mubr.msk.bf16.mxu1 %vm1721_vm1, %v1720_v2  ;;  %v722_v43 = vsel %vm720_vm5, %v656_v41, 0  ;;  %v893_v16 = vrot.slane %v1981_v15, %v892_v14 }
 0x11e   : > { %v653_v44 = vpop.f32.mrf.mxu0  ;;  %1440 = vmatpush3.bf16.msra.mxu0 %v722_v43 }
 0x11f   : > { %1451 = vmatprep.subr.bf16.mxu0 %v1720_v2  ;;  %v1579_v44 = vld [vmem:[%s1903_s26 + $0x8] sm:$0xff]  }
 0x120   : > { %v1432_v45 = vpop.f32.mrf.mxu0 }
 0x121   : > { %v1580_v45 = vld [vmem:[%s1903_s26] sm:$0xff]  }
 0x186   : > { %v770_v22 = vpop.permute.xlu0 %769 }
 0x187   : > { %v775_v23 = vsel %vm657_vm3, %v770_v22, 0 }
 0x188   : > { %1446 = vmatpush3.bf16.xpose.msra.mxu1 %v775_v23 }
 0x189   : > { %1457 = vmatprep.subr.bf16.mxu1 %v1720_v2 }
 0x18a   : > { %v767_v24 = vpop.permute.xlu0 %766 }
 0x18f   : > { %1448 = vmatmul.mubr.msk.bf16.vlgmr.msra.gmra.mxu1 %vm657_vm3, %v767_v24 }
 0x190   : > { %1461 = vmatprep.mubr.msk.bf16.mxu1 %vm1721_vm1, %v1720_v2  ;;  %1458 = vmatpush3.bf16.msra.mxu1 %v1573_v1 }
 0x191   : > { %1459 = vmatprep.subr.bf16.mxu1 %v1720_v2 }
 0x194   : > { %1460 = vmatpush3.bf16.msra.mxu1 %v1574_v3 }
 0x195   : > { %1473 = vmatprep.subr.bf16.mxu1 %v1720_v2 }
 0x1dc   : > { %v698_v25 = vpop.f32.mrf.mxu1 }
 0x1dd   : > { %v705_v26 = vsel %vm704_vm4, %v698_v25, -inf }
 0x1de   : > { %706 = vmax.xlane.f32.xlu1 %v705_v26  ;;  %v1437_v27 = vpop.f32.mrf.mxu1 }
 0x1e0   : > { %v701_v28 = vpop.f32.mrf.mxu1 }
 0x1e2   : > { %v1438_v29 = vpop.f32.mrf.mxu1 }
 0x1e3   : > { %v1575_v29 = vld [vmem:[%s1898_s8 + $0x8] sm:$0xff]  }
 0x24f   : > { %v811_v30 = vpop.f32.mrf.mxu1 }
 0x250   : > { %v817_v31 = vsel %vm704_vm4, %v811_v30, -inf }
 0x251   : > { %818 = vmax.xlane.f32.xlu1 %v817_v31  ;;  %v1449_v32 = vpop.f32.mrf.mxu1  ;;  %v1578_v31 = vld [vmem:[%s1903_s26 + $0x10] sm:$0xff]  }
 0x253   : > { %v814_v33 = vpop.f32.mrf.mxu1 }
 0x255   : > { %v1450_v34 = vpop.f32.mrf.mxu1 }
 0x267   : > { %v707_v35 = vpop.xlane.xlu1 %706 }
 0x268   : > { %v708_v36 = vsub.f32 %v698_v25, %v707_v35  ;;  %v966_v35 = vsub.s32 3, %v1977_v13 }
 0x26a   : > { %v709_v37 = vmul.f32 1.442695, %v708_v36  ;;  %v971_v36 = vsub.s32 4, %v1977_v13 }
 0x26c   : > { %1581 = vpow2.f32 %v709_v37  ;;  %v967_v37 = vrot.slane %v1981_v15, %v966_v35  ;;  %v972_v40 = vrot.slane %v1981_v15, %v971_v36 }
 0x279   : > { %v1582_v38 = vpop.eup %1581 }
 0x27a   : > { %v711_v39 = vsel %vm704_vm4, %v1582_v38, 0.0 }
 0x27b   : > { %712 = vadd.xlane.f32.xlu0 %v711_v39 }
 0x2da   : > { %v819_v46 = vpop.xlane.xlu1 %818 }
 0x2db   : > { %v820_v47 = vsub.f32 %v811_v30, %v819_v46  ;;  %v1576_v30 = vld [vmem:[%s1898_s8] sm:$0xff]   ;;  %v981_v46 = vsub.s32 1, %v1977_v13  ;;  %s1372_s8 = sshll.u32 %s1705_s9, 7  ;;  %s1627_s9 = scalar_lea.vmem %s1626_s16, 256 }
 0x2dc   : > { %s1157_s23 = scalar_lea.hbm %s2101_s12, %s1372_s8  ;;  %p1629_p5 = scmp.lt.s32.totalorder %s1627_s9, %s1621_s27 }
 0x2dd   : > { %v821_v48 = vmul.f32 1.442695, %v820_v47  ;;  %v982_v47 = vrot.slane %v1981_v15, %v981_v46 }
 0x2de   : > { %p1630_p6 = por %p1629_p5, %p1628_p4 }
 0x2df   : > { %1583 = vpow2.f32 %v821_v48 }
 0x2e0   : > { %p1631_p7 = pnand %p1630_p6, %p1624_p2 }
 0x2ec   : > { %v1584_v49 = vpop.eup %1583 }
 0x2ed   : > { %v823_v50 = vsel %vm704_vm4, %v1584_v49, 0.0 }
 0x2ee   : > { %824 = vadd.xlane.f32.xlu1 %v823_v50 }
 0x2ff   : > { %830 = vrot.lane.b32.xlu1 %v656_v41, %s1722_s0 }
 0x304   : > { %v713_v51 = vpop.xlane.xlu0 %712 }
 0x305   : > { %1585 = vrcp.f32 %v713_v51 }
 0x312   : > { %v1586_v52 = vpop.eup %1585 }
 0x313   : > { %v715_v53 = vmul.f32 %v1586_v52, %v1582_v38 }
 0x315   : > { %v716_v54 = vpack.c.bf16 %v715_v53, %v715_v53 }
 0x317   : > { %1442 = vmatmul.mubr.msk.bf16.vlgmr.msra.gmra.mxu0 %vm704_vm4, %v716_v54 }
 0x318   : > { %1453 = vmatprep.mubr.msk.bf16.mxu0 %vm1721_vm1, %v1720_v2 }
 0x377   : > { %v825_v55 = vpop.xlane.xlu1 %824 }
 0x378   : > { %1587 = vrcp.f32 %v825_v55  ;;  %v1050_v55 = vsub.s32 2, %v1977_v13 }
 0x37b   : > { %v831_v56 = vpop.permute.xlu1 %830 }
 0x37c   : > { %v836_v57 = vsel %vm720_vm5, %v831_v56, 0  ;;  %v1051_v56 = vrot.slane %v1981_v15, %v1050_v55 }
 0x37d   : > { %1452 = vmatpush3.bf16.msra.mxu0 %v836_v57 }
 0x37e   : > { %1465 = vmatprep.subr.bf16.mxu0 %v1720_v2 }
 0x385   : > { %v1588_v58 = vpop.eup %1587 }
 0x386   : > { %v827_v59 = vmul.f32 %v1588_v58, %v1584_v49 }
 0x388   : > { %v828_v60 = vpack.c.bf16 %v827_v59, %v827_v59 }
 0x38a   : > { %1454 = vmatmul.mubr.msk.bf16.vlgmr.msra.gmra.mxu0 %vm704_vm4, %v828_v60 }
 0x38b   : > { %1469 = vmatprep.mubr.msk.bf16.mxu0 %vm1721_vm1, %v1720_v2  ;;  %1466 = vmatpush3.bf16.msra.mxu0 %v1575_v29 }
 0x38c   : > { %1467 = vmatprep.subr.bf16.mxu0 %v1720_v2 }
 0x38f   : > { %1468 = vmatpush3.bf16.msra.mxu0 %v1576_v30 }
 0x3d7   : > { %v758_v61 = vpop.f32.mrf.mxu0 }
 0x3d8   : > { %764 = vst.msk [vmem:[#allocation2] sm:$0xff] %vm657_vm3, %v758_v61 }
 0x3d9   : > { %v1443_v62 = vpop.f32.mrf.mxu0 }
 0x3db   : > { %v761_v63 = vpop.f32.mrf.mxu0 }
 0x3dd   : > { %v1444_v0 = vpop.f32.mrf.mxu0 }
 0x44a   : > { %v872_v4 = vpop.f32.mrf.mxu0 }
 0x44b   : > { %879 = vrot.lane.b32.xlu1 %v872_v4, %s1723_s1 }
 0x44c   : > { %v1455_v5 = vpop.f32.mrf.mxu0 }
 0x44e   : > { %v875_v7 = vpop.f32.mrf.mxu0 }
 0x450   : > { %v1456_v8 = vpop.f32.mrf.mxu0 }
 0x4bd   : > { %v880_v9 = vpop.permute.xlu1 %879 }
 0x4be   : > { %883 = vst.msk [vmem:[#allocation2] sm:$0xff] %vm882_vm6, %v880_v9  ;;  %v1136_v9 = vsub.s32 5, %v1977_v13 }
 0x4c5   : > { %v884_v10 = vld [vmem:[#allocation2] sm:$0xff] }
 0x4c6   : > { %v885_v11 = vpack.c.bf16 %v884_v10, %v884_v10  ;;  %v1141_v10 = vsub.s32 6, %v1977_v13 }
 0x4c8   : > { %1462 = vmatmul.mubr.msk.bf16.vlgmr.msra.gmra.mxu1 %vm497_vm2, %v885_v11  ;;  %v1137_v11 = vrot.slane %v1981_v15, %v1136_v9 }
 0x4c9   : > { %1481 = vmatprep.mubr.msk.bf16.mxu1 %vm1721_vm1, %v1720_v2 }
 0x588   : > { %v943_v17 = vpop.f32.mrf.mxu1 }
 0x589   : > { %v944_v18 = vadd.f32 %v943_v17, %v893_v16  ;;  %v1142_v16 = vrot.slane %v1981_v15, %v1141_v10 }
 0x58a   : > { %v1463_v19 = vpop.f32.mrf.mxu1 }
 0x58b   : > { %v949_v20 = vadd.f32 %v944_v18, %v1923_v6  ;;  %v1577_v6 = vld [vmem:[%s1903_s26 + $0x18] sm:$0xff]  }
 0x58c   : > { %v946_v21 = vpop.f32.mrf.mxu1  ;;  %1474 = vmatpush3.bf16.msra.mxu1 %v1577_v6 }
 0x58d   : > { %v950_v22 = vsel %vm497_vm2, %v949_v20, 0.0  ;;  %1475 = vmatprep.subr.bf16.mxu1 %v1720_v2 }
 0x58e   : > { %951 = vadd.xlane.f32.xlu1 %v950_v22  ;;  %v1464_v23 = vpop.f32.mrf.mxu1 }
 0x590   : > { %1476 = vmatpush3.bf16.msra.mxu1 %v1578_v31 }
 0x591   : > { %1477 = vmatprep.subr.bf16.mxu1 %v1720_v2 }
 0x594   : > { %1478 = vmatpush3.bf16.msra.mxu1 %v1579_v44 }
 0x595   : > { %1479 = vmatprep.subr.bf16.mxu1 %v1720_v2 }
 0x598   : > { %1480 = vmatpush3.bf16.msra.mxu1 %v1580_v45 }
 0x617   : > { %v952_v24 = vpop.xlane.xlu1 %951 }
 0x618   : > { %v954_v25 = vmul.f32 0.03125, %v952_v24 }
 0x61a   : > { %v955_v26 = vsub.f32 %v949_v20, %v954_v25 }
 0x61c   : > { %v956_v27 = vmul.f32 %v955_v26, %v955_v26 }
 0x61e   : > { %v957_v28 = vsel %vm497_vm2, %v956_v27, 0.0 }
 0x61f   : > { %958 = vadd.xlane.f32.xlu0 %v957_v28 }
 0x6a8   : > { %v959_v32 = vpop.xlane.xlu0 %958 }
 0x6a9   : > { %v960_v33 = vmul.f32 0.03125, %v959_v32 }
 0x6ab   : > { %v961_v34 = vadd.f32 1e-06, %v960_v33 }
 0x6ad   : > { %1589 = vrsqrt.f32 %v961_v34 }
 0x6ba   : > { %v1590_v38 = vpop.eup %1589 }
 0x6bb   : > { %v963_v39 = vmul.f32 %v1590_v38, %v955_v26 }
 0x6bd   : > { %v968_v41 = vmul.f32 %v967_v37, %v963_v39 }
 0x6bf   : > { %v973_v42 = vadd.f32 %v972_v40, %v968_v41 }
 0x6c1   : > { %v974_v43 = vpack.c.bf16 %v973_v42, %v973_v42 }
 0x6c3   : > { %1470 = vmatmul.mubr.msk.bf16.vlgmr.msra.gmra.mxu0 %vm497_vm2, %v974_v43 }
 0x783   : > { %v1032_v48 = vpop.f32.mrf.mxu0 }
 0x784   : > { %v1033_v49 = vadd.f32 %v1032_v48, %v982_v47 }
 0x785   : > { %v1471_v50 = vpop.f32.mrf.mxu0 }
 0x786   : > { %v1038_v51 = vmax.f32 %v1033_v49, 0.0 }
 0x787   : > { %v1035_v52 = vpop.f32.mrf.mxu0 }
 0x788   : > { %v1039_v53 = vpack.c.bf16 %v1038_v51, %v1038_v51 }
 0x789   : > { %v1472_v54 = vpop.f32.mrf.mxu0 }
 0x78a   : > { %1482 = vmatmul.mubr.msk.bf16.vlgmr.msra.gmra.mxu1 %vm1076_vm7, %v1039_v53 }
 0x84a   : > { %v1114_v2 = vpop.f32.mrf.mxu1 }
 0x84b   : > { %v1115_v57 = vadd.f32 %v1114_v2, %v1051_v56 }
 0x84c   : > { %v1483_v58 = vpop.f32.mrf.mxu1 }
 0x84d   : > { %v1120_v59 = vadd.f32 %v1115_v57, %v973_v42 }
 0x84e   : > { %v1117_v60 = vpop.f32.mrf.mxu1 }
 0x84f   : > { %v1121_v61 = vsel %vm497_vm2, %v1120_v59, 0.0 }
 0x850   : > { %1122 = vadd.xlane.f32.xlu0 %v1121_v61  ;;  %v1484_v62 = vpop.f32.mrf.mxu1 }
 0x8d9   : > { %v1123_v63 = vpop.xlane.xlu0 %1122 }
 0x8da   : > { %v1124_v0 = vmul.f32 0.03125, %v1123_v63 }
 0x8dc   : > { %v1125_v1 = vsub.f32 %v1120_v59, %v1124_v0 }
 0x8de   : > { %v1126_v3 = vmul.f32 %v1125_v1, %v1125_v1 }
 0x8e0   : > { %v1127_v4 = vsel %vm497_vm2, %v1126_v3, 0.0 }
 0x8e1   : > { %1128 = vadd.xlane.f32.xlu0 %v1127_v4 }
 0x96a   : > { %v1129_v5 = vpop.xlane.xlu0 %1128 }
 0x96b   : > { %v1130_v7 = vmul.f32 0.03125, %v1129_v5 }
 0x96d   : > { %v1131_v8 = vadd.f32 1e-06, %v1130_v7 }
 0x96f   : > { %1591 = vrsqrt.f32 %v1131_v8 }
 0x97c   : > { %v1592_v12 = vpop.eup %1591 }
 0x97d   : > { %v1133_v14 = vmul.f32 %v1592_v12, %v1125_v1 }
 0x97f   : > { %v1138_v17 = vmul.f32 %v1137_v11, %v1133_v14 }
 0x981   : > { %v1143_v18 = vadd.f32 %v1142_v16, %v1138_v17 }
 0x983   : > { %1144 = vst.msk [vmem:[%s1910_s2] sm:$0xff] %vm497_vm2, %v1143_v18 }
 0x984   : > { %1634 = shalt.err (!%p1631_p7)
}
 0x985   : > { %s1635_s13 = scalar_lea.hbm %s1157_s23, 128  ;;  %s1639_s19 = scalar_lea.hbm %s2102_s22, 256 }
 0x986   : > { %p1636_p8 = scmp.ne.s32.totalorder %s1157_s23, %s1635_s13  ;;  %p1640_p13 = scmp.lt.s32.totalorder %s1157_s23, %s2102_s22 }
 0x987   : > { %p1641_p0 = scmp.lt.s32.totalorder %s1639_s19, %s1635_s13 }
 0x988   : > { %p1637_p12 = pnand %p1636_p8, %p1833_p10 }
 0x989   : > { %p1642_p9 = por %p1641_p0, %p1640_p13 }
 0x98a   : > { %p1638_p3 = pneg %p1637_p12 }
 0x98c   : > { %p1643_p11 = pnand %p1642_p9, %p1638_p3 }
 0x98e   : > { %1646 = shalt.err (!%p1643_p11)
}
 0x98f   : > { %1487 = dma.vmem_to_hbm [thread:$0]  (%p1833_p10), %s1160_s28, 128, %s1157_s23, %s1146_s14  }
 0x990 PF: > { %s2103_s17 = sld [smem:[#allocation14_spill]] }
 0x991   : > { %s2104_s26 = sld [smem:[#allocation9_spill]] }
 0x992   : > { %s2105_s10 = sld [smem:[#allocation17_spill]] }
 0x996   : > { %p1498_p1 = scmp.ge.s32.totalorder %s2103_s17, 2 }
 0x997   : > { %s1171_s11 = sand.u32 1, %s2104_s26  }
 0x998   : > { %p2106_p2 = scmp.ne.s32.totalorder %s2105_s10, 0  ;;  %s1172_s24 = scalar_lea.sflag [#allocation5], %s1171_s11 }
 0x99a   : > { %p1494_p4 = pnand %p1498_p1, %p2106_p2 }
 0x99c   : > { %p1495_p5 = pneg %p1494_p4 }
 0x99e   : > { %1684 = dma.done.wait (%p1495_p5), %s1172_s24, 128  }
 0x99f   : > { %1686 = vsyncadd (%p1495_p5), %s1172_s24, 4294967168  ;;  %s24_s12 = sadd.s32 1, %s2103_s17   ;;  %s2107_s27 = sld [smem:[#allocation10_spill]] }
 0x9a0   : > { %p21_p6 = scmp.ge.s32.totalorder %s24_s12, 6   ;;  %s2108_s28 = sld [smem:[#allocation11_spill]] }
 0x9a1   : > { %s2109_s29 = sld [smem:[#allocation18_spill]] }
 0x9a2   : > { %s2110_s30 = sld [smem:[#allocation12_spill]]  ;;  %23 = sbr.rel (!%p21_p6) target bundleno = 12 (0xc), region = 122 }
 0x9a3   : > { %s2111_s9 = sld [smem:[#allocation13_spill]] }
 0x9a4   : > { %s2112_s10 = sld [smem:[#allocation15_spill]] }
 0x9a5   : > { %s2113_s11 = sld [smem:[#allocation16_spill]] }
 0x9a7   :  { %1177 = vsyncpa [#allocation4], 1 }
 0x9a8   :  { %1179 = vsyncpa [#allocation4 + $0x1], 1 }
 0x9a9   :  { %1180 = vsyncpa [#allocation5], 1 }
 0x9aa   :  { %1182 = vsyncpa [#allocation5 + $0x1], 1 }

</bundles_post_ra>
